<compile_context>
chip_gen: v6e
topology: v6e:2x2x1
jax: 0.10.0
libtpu: 0.0.40
codegen_flags: <defaults>
</compile_context>

<pallas_src>
import jax
import jax.numpy as jnp
from jax import lax
from jax.experimental import pallas as pl
from jax.experimental.pallas import tpu as pltpu

LANE = 128        # lane width (last dim of every tile)
ACC_ROWS = 8      # sublane rows of the (8,128) f32 vreg accumulator


def _cdiv(a, b):
    return -(-a // b)


def _round_up(x, m):
    return _cdiv(x, m) * m


def _device_config():
    """(tensorcores, default block rows, vmem limit bytes) per chip gen."""
    kind = ""
    try:
        kind = jax.devices()[0].device_kind.lower()
    except Exception:
        pass
    if "v7" in kind or "7x" in kind:
        # 2 TCs/chip, only 64 MiB VMEM per TC -> keep the scoped limit low.
        return 2, 8192, 48 * 1024 * 1024
    if "v4" in kind or "v5p" in kind:
        # Megacore chips: 2 cores, 128 MiB VMEM.
        return 2, 8192, 64 * 1024 * 1024
    # v5e / v6e: single TensorCore, 128 MiB physical VMEM.
    return 1, 8192, 64 * 1024 * 1024


def _min_sublanes(*dtypes):
    """Minimum sublane multiple so every streamed dtype tiles cleanly
    ((8,128) for 32-bit, (16,128) for 16-bit, (32,128) for 8-bit)."""
    m = ACC_ROWS
    for dt in dtypes:
        size = max(1, jnp.dtype(dt).itemsize)
        if size < 4:
            m = max(m, ACC_ROWS * (4 // size))
    return m


def _bce_elementwise(p_raw, t_raw):
    """Clamped elementwise BCE, matching torch.nn.BCELoss (log clamp -100)."""
    p = p_raw.astype(jnp.float32)
    t = t_raw.astype(jnp.float32)
    log_p = jnp.maximum(jnp.log(p), jnp.float32(-100.0))
    log_1mp = jnp.maximum(jnp.log(1.0 - p), jnp.float32(-100.0))
    # -(t*log_p + (1-t)*log_1mp) rewritten with one fewer multiply.
    # TODO(synk): if targets are known binary {0,1}, a single log of
    # jnp.where(t > 0.5, p, 1 - p) would halve EUP work (matters on v7x).
    return -(log_1mp + t * (log_p - log_1mp))


def _fold(x, chunk):
    """(chunk, LANE) -> (ACC_ROWS, LANE) using only VPU adds (no XLU)."""
    if chunk == ACC_ROWS:
        return x
    return jnp.sum(x.reshape(chunk // ACC_ROWS, ACC_ROWS, LANE), axis=0)


def _make_kernel(*, masked, rows, tm, chunk, has_partial, unroll):
    n_chunks = tm // chunk

    def kernel(*refs):
        if masked:
            pred_ref, target_ref, mask_ref, loss_out_ref, msum_out_ref = refs
        else:
            pred_ref, target_ref, loss_out_ref = refs
            mask_ref = msum_out_ref = None

        @pl.when(pl.program_id(1) == 0)
        def _init():
            loss_out_ref[...] = jnp.zeros_like(loss_out_ref)
            if masked:
                msum_out_ref[...] = jnp.zeros_like(msum_out_ref)

        def block_sums(row_limit):
            """Sum this block's loss (and mask) into (8,128) register carries.
            row_limit=None -> every row valid (fast path, no masking)."""
            def body(ci, carry):
                r = pl.multiple_of(ci * chunk, chunk)
                loss = _bce_elementwise(pred_ref[pl.ds(r, chunk), :],
                                        target_ref[pl.ds(r, chunk), :])
                m = None
                if masked:
                    m = mask_ref[pl.ds(r, chunk), :].astype(jnp.float32)
                    loss = loss * m
                if row_limit is not None:
                    rid = r + lax.broadcasted_iota(jnp.int32, (chunk, LANE), 0)
                    keep = rid < row_limit
                    # Select (not multiply): out-of-bounds rows of a partial
                    # block may hold NaN/Inf garbage.
                    loss = jnp.where(keep, loss, 0.0)
                    if masked:
                        m = jnp.where(keep, m, 0.0)
                if masked:
                    acc_l, acc_m = carry
                    return acc_l + _fold(loss, chunk), acc_m + _fold(m, chunk)
                return carry + _fold(loss, chunk)

            zero = jnp.zeros((ACC_ROWS, LANE), jnp.float32)
            init = (zero, zero) if masked else zero
            return lax.fori_loop(0, n_chunks, body, init, unroll=unroll)

        def accumulate(res):
            if masked:
                loss_out_ref[...] += res[0][None]
                msum_out_ref[...] += res[1][None]
            else:
                loss_out_ref[...] += res[None]

        if not has_partial:
            accumulate(block_sums(None))
        else:
            # Unclamped global block index -> number of valid rows here.
            blk = pl.program_id(0) * pl.num_programs(1) + pl.program_id(1)
            valid_rows = jnp.clip(rows - blk * tm, 0, tm)

            @pl.when(valid_rows == tm)
            def _full():
                accumulate(block_sums(None))

            @pl.when(valid_rows < tm)
            def _partial():
                accumulate(block_sums(valid_rows))

    return kernel


def mask_bce_loss(pred, target, mask=None, *, block_rows=None):
    """Pallas equivalent of MaskBCELoss.forward(pred, target, mask)."""
    n = pred.size
    inputs = (pred, target) if mask is None else (pred, target, mask)

    # Aligned prefix is streamed by the kernel; the <128-element ragged tail
    # is folded in by a tiny jnp epilogue (never pads/copies the whole array).
    n_main = (n // LANE) * LANE
    rows = n_main // LANE

    def tail_terms():
        if n_main == n:
            return jnp.float32(0.0), jnp.float32(0.0)
        p_t = pred.reshape(-1)[n_main:]
        t_t = target.reshape(-1)[n_main:]
        loss = _bce_elementwise(p_t, t_t)
        if mask is None:
            return jnp.sum(loss), jnp.float32(0.0)
        m_t = mask.reshape(-1)[n_main:].astype(jnp.float32)
        return jnp.sum(loss * m_t), jnp.sum(m_t)

    if rows == 0:
        # Fewer than 128 elements: pure-jnp fallback.
        loss_sum, m_sum = tail_terms()
        denom = m_sum if mask is not None else jnp.float32(n)
        return loss_sum / denom

    ncores_dev, tm_default, vmem_bytes = _device_config()
    chunk = _min_sublanes(*(x.dtype for x in inputs))
    tm_req = tm_default if block_rows is None else block_rows
    tm = min(_round_up(tm_req, chunk), _round_up(rows, chunk))
    num_blocks = _cdiv(rows, tm)
    ncores = ncores_dev if num_blocks >= 2 else 1
    bpc = _cdiv(num_blocks, ncores)
    has_partial = (rows % tm != 0) or (ncores * bpc != num_blocks)
    unroll = max(1, min(8, tm // chunk))

    def slab(x):
        if n_main == n:
            return x.reshape(rows, LANE)          # contiguous reshape: free
        # TODO(synk): a manual-DMA (pl.ANY) path could also avoid this
        # prefix-slice copy for numel % 128 != 0.
        return x.reshape(-1)[:n_main].reshape(rows, LANE)

    def in_map(c, i):
        # Clamp so overscan grid steps DMA a real block; their contribution
        # is zeroed by the row mask in the kernel's partial-block branch.
        return (jnp.minimum(c * bpc + i, num_blocks - 1), 0)

    in_spec = pl.BlockSpec((tm, LANE), in_map)
    out_spec = pl.BlockSpec((1, ACC_ROWS, LANE), lambda c, i: (c, 0, 0))
    part_shape = jax.ShapeDtypeStruct((ncores, ACC_ROWS, LANE), jnp.float32)
    cparams = pltpu.CompilerParams(
        dimension_semantics=("parallel", "arbitrary"),
        vmem_limit_bytes=vmem_bytes)

    kernel = _make_kernel(masked=mask is not None, rows=rows, tm=tm,
                          chunk=chunk, has_partial=has_partial, unroll=unroll)

    grid_spec = pltpu.PrefetchScalarGridSpec(
        num_scalar_prefetch=0,
        grid=(ncores, bpc),
        in_specs=[in_spec] * len(inputs),
        out_specs=out_spec if mask is None else (out_spec, out_spec))

    result = pl.pallas_call(
        kernel,
        out_shape=part_shape if mask is None else (part_shape, part_shape),
        grid_spec=grid_spec,
        compiler_params=cparams,
    )(*(slab(x) for x in inputs))

    tail_loss, tail_m = tail_terms()
    if mask is None:
        return (jnp.sum(result) + tail_loss) / jnp.float32(n)
    loss_part, msum_part = result
    # Note: an all-zero mask yields NaN (0/0), matching torch's behavior.
    return (jnp.sum(loss_part) + tail_loss) / (jnp.sum(msum_part) + tail_m)


def _reference(pred, target, mask=None):
    p = pred.astype(jnp.float32)
    t = target.astype(jnp.float32)
    log_p = jnp.maximum(jnp.log(p), -100.0)
    log_1mp = jnp.maximum(jnp.log(1.0 - p), -100.0)
    loss = -(t * log_p + (1.0 - t) * log_1mp)
    if mask is not None:
        return (loss * mask).sum() / mask.sum()
    return loss.sum() / loss.size


if __name__ == "__main__":
    key = jax.random.PRNGKey(0)
    k1, k2, k3, k4, k5, k6 = jax.random.split(key, 6)

    # Small NCHW-shaped inputs, as a conv-style predictor would produce.
    shape = (2, 4, 16, 16)
    pred = jax.nn.sigmoid(jax.random.normal(k1, shape, dtype=jnp.float32))
    target = (jax.random.uniform(k2, shape) > 0.5).astype(jnp.float32)
    mask = (jax.random.uniform(k3, shape) > 0.3).astype(jnp.float32)

    out_masked = mask_bce_loss(pred, target, mask)
    jax.block_until_ready(out_masked)
    ref_masked = _reference(pred, target, mask)
    assert jnp.allclose(out_masked, ref_masked, rtol=1e-5, atol=1e-5), (
        out_masked, ref_masked)

    out_plain = mask_bce_loss(pred, target, None)
    jax.block_until_ready(out_plain)
    ref_plain = _reference(pred, target, None)
    assert jnp.allclose(out_plain, ref_plain, rtol=1e-5, atol=1e-5), (
        out_plain, ref_plain)

    # Ragged size (numel % 128 != 0) with tiny blocks to exercise the
    # multi-block grid, the partial last block, the clamped overscan block
    # and the <128-element jnp tail epilogue.
    shape2 = (2, 5, 10, 25)   # 2500 elements
    pred2 = jax.nn.sigmoid(jax.random.normal(k4, shape2, dtype=jnp.float32))
    target2 = (jax.random.uniform(k5, shape2) > 0.5).astype(jnp.float32)
    mask2 = (jax.random.uniform(k6, shape2) > 0.3).astype(jnp.float32)

    out2 = mask_bce_loss(pred2, target2, mask2, block_rows=8)
    jax.block_until_ready(out2)
    ref2 = _reference(pred2, target2, mask2)
    assert jnp.allclose(out2, ref2, rtol=1e-5, atol=1e-5), (out2, ref2)

    out2u = mask_bce_loss(pred2, target2, None, block_rows=8)
    jax.block_until_ready(out2u)
    ref2u = _reference(pred2, target2, None)
    assert jnp.allclose(out2u, ref2u, rtol=1e-5, atol=1e-5), (out2u, ref2u)

    print("KERNEL_OK")
</pallas_src>

<mosaic_0001>
module attributes {stable_mosaic.version = 11 : i64} {
  func.func @kernel(%arg0: i32, %arg1: i32, %arg2: memref<16x128xf32, #tpu.memory_space<vmem>>, %arg3: memref<16x128xf32, #tpu.memory_space<vmem>>, %arg4: memref<16x128xf32, #tpu.memory_space<vmem>>, %arg5: memref<1x8x128xf32, #tpu.memory_space<vmem>>, %arg6: memref<1x8x128xf32, #tpu.memory_space<vmem>>) attributes {dimension_semantics = [#tpu.dimension_semantics<parallel>, #tpu.dimension_semantics<arbitrary>], iteration_bounds = array<i64: 1, 1>, scalar_prefetch = 0 : i64, scratch_operands = 0 : i64, tpu.core_type = #tpu.core_type<tc>, window_params = [{transform_indices = @transform_0, window_bounds = array<i64: 16, 128>}, {transform_indices = @transform_1, window_bounds = array<i64: 16, 128>}, {transform_indices = @transform_2, window_bounds = array<i64: 16, 128>}, {transform_indices = @transform_3, window_bounds = array<i64: 1, 8, 128>}, {transform_indices = @transform_4, window_bounds = array<i64: 1, 8, 128>}]} {
    %c0_i32 = arith.constant 0 : i32
    %0 = arith.cmpi eq, %arg1, %c0_i32 : i32
    %1 = arith.extui %0 : i1 to i32
    %c0_i32_0 = arith.constant 0 : i32
    %2 = arith.cmpi ne, %1, %c0_i32_0 : i32
    scf.if %2 {
      %cst_28 = arith.constant 0.000000e+00 : f32
      %60 = vector.broadcast %cst_28 : f32 to vector<1x8x128xf32>
      %c0_29 = arith.constant 0 : index
      %c0_30 = arith.constant 0 : index
      %c0_31 = arith.constant 0 : index
      %61 = vector.load %arg5[%c0_29, %c0_30, %c0_31] : memref<1x8x128xf32, #tpu.memory_space<vmem>>, vector<1x8x128xf32>
      tpu.vector_store %arg5[%c0_29, %c0_30, %c0_31], %60 {strides = array<i32>} : memref<1x8x128xf32, #tpu.memory_space<vmem>>, vector<1x8x128xf32>,
      %cst_32 = arith.constant 0.000000e+00 : f32
      %62 = vector.broadcast %cst_32 : f32 to vector<1x8x128xf32>
      %c0_33 = arith.constant 0 : index
      %c0_34 = arith.constant 0 : index
      %c0_35 = arith.constant 0 : index
      %63 = vector.load %arg6[%c0_33, %c0_34, %c0_35] : memref<1x8x128xf32, #tpu.memory_space<vmem>>, vector<1x8x128xf32>
      tpu.vector_store %arg6[%c0_33, %c0_34, %c0_35], %62 {strides = array<i32>} : memref<1x8x128xf32, #tpu.memory_space<vmem>>, vector<1x8x128xf32>,
    } else {
    }
    %cst = arith.constant 0.000000e+00 : f32
    %3 = vector.broadcast %cst : f32 to vector<8x128xf32>
    %c0_i32_1 = arith.constant 0 : i32
    %c8_i32 = arith.constant 8 : i32
    %4 = arith.muli %c0_i32_1, %c8_i32 : i32
    %5 = tpu.assume_multiple %4, 8 : i32
    %6 = arith.index_cast %5 : i32 to index
    %c0 = arith.constant 0 : index
    %7 = vector.load %arg2[%6, %c0] : memref<16x128xf32, #tpu.memory_space<vmem>>, vector<8x128xf32>
    %8 = arith.index_cast %5 : i32 to index
    %c0_2 = arith.constant 0 : index
    %9 = vector.load %arg3[%8, %c0_2] : memref<16x128xf32, #tpu.memory_space<vmem>>, vector<8x128xf32>
    %10 = math.log %7 : vector<8x128xf32>
    %cst_3 = arith.constant -1.000000e+02 : f32
    %11 = vector.broadcast %cst_3 : f32 to vector<8x128xf32>
    %12 = arith.maximumf %10, %11 : vector<8x128xf32>
    %cst_4 = arith.constant 1.000000e+00 : f32
    %13 = vector.broadcast %cst_4 : f32 to vector<8x128xf32>
    %14 = arith.subf %13, %7 : vector<8x128xf32>
    %15 = math.log %14 : vector<8x128xf32>
    %cst_5 = arith.constant -1.000000e+02 : f32
    %16 = vector.broadcast %cst_5 : f32 to vector<8x128xf32>
    %17 = arith.maximumf %15, %16 : vector<8x128xf32>
    %18 = arith.subf %12, %17 : vector<8x128xf32>
    %19 = arith.mulf %9, %18 : vector<8x128xf32>
    %20 = arith.addf %17, %19 : vector<8x128xf32>
    %cst_6 = arith.constant 0.000000e+00 : f32
    %21 = vector.broadcast %cst_6 : f32 to vector<8x128xf32>
    %22 = arith.subf %21, %20 : vector<8x128xf32>
    %23 = arith.index_cast %5 : i32 to index
    %c0_7 = arith.constant 0 : index
    %24 = vector.load %arg4[%23, %c0_7] : memref<16x128xf32, #tpu.memory_space<vmem>>, vector<8x128xf32>
    %25 = arith.mulf %22, %24 : vector<8x128xf32>
    %26 = arith.addf %3, %25 : vector<8x128xf32>
    %27 = arith.addf %3, %24 : vector<8x128xf32>
    %c1_i32 = arith.constant 1 : i32
    %c8_i32_8 = arith.constant 8 : i32
    %28 = arith.muli %c1_i32, %c8_i32_8 : i32
    %29 = tpu.assume_multiple %28, 8 : i32
    %30 = arith.index_cast %29 : i32 to index
    %c0_9 = arith.constant 0 : index
    %31 = vector.load %arg2[%30, %c0_9] : memref<16x128xf32, #tpu.memory_space<vmem>>, vector<8x128xf32>
    %32 = arith.index_cast %29 : i32 to index
    %c0_10 = arith.constant 0 : index
    %33 = vector.load %arg3[%32, %c0_10] : memref<16x128xf32, #tpu.memory_space<vmem>>, vector<8x128xf32>
    %34 = math.log %31 : vector<8x128xf32>
    %cst_11 = arith.constant -1.000000e+02 : f32
    %35 = vector.broadcast %cst_11 : f32 to vector<8x128xf32>
    %36 = arith.maximumf %34, %35 : vector<8x128xf32>
    %cst_12 = arith.constant 1.000000e+00 : f32
    %37 = vector.broadcast %cst_12 : f32 to vector<8x128xf32>
    %38 = arith.subf %37, %31 : vector<8x128xf32>
    %39 = math.log %38 : vector<8x128xf32>
    %cst_13 = arith.constant -1.000000e+02 : f32
    %40 = vector.broadcast %cst_13 : f32 to vector<8x128xf32>
    %41 = arith.maximumf %39, %40 : vector<8x128xf32>
    %42 = arith.subf %36, %41 : vector<8x128xf32>
    %43 = arith.mulf %33, %42 : vector<8x128xf32>
    %44 = arith.addf %41, %43 : vector<8x128xf32>
    %cst_14 = arith.constant 0.000000e+00 : f32
    %45 = vector.broadcast %cst_14 : f32 to vector<8x128xf32>
    %46 = arith.subf %45, %44 : vector<8x128xf32>
    %47 = arith.index_cast %29 : i32 to index
    %c0_15 = arith.constant 0 : index
    %48 = vector.load %arg4[%47, %c0_15] : memref<16x128xf32, #tpu.memory_space<vmem>>, vector<8x128xf32>
    %49 = arith.mulf %46, %48 : vector<8x128xf32>
    %50 = arith.addf %26, %49 : vector<8x128xf32>
    %51 = arith.addf %27, %48 : vector<8x128xf32>
    %c2_i32 = arith.constant 2 : i32
    %c0_16 = arith.constant 0 : index
    %c0_17 = arith.constant 0 : index
    %c0_18 = arith.constant 0 : index
    %52 = vector.load %arg5[%c0_16, %c0_17, %c0_18] : memref<1x8x128xf32, #tpu.memory_space<vmem>>, vector<1x8x128xf32>
    %53 = vector.shape_cast %50 : vector<8x128xf32> to vector<1x8x128xf32>
    %54 = arith.addf %52, %53 : vector<1x8x128xf32>
    %c0_19 = arith.constant 0 : index
    %c0_20 = arith.constant 0 : index
    %c0_21 = arith.constant 0 : index
    %55 = vector.load %arg5[%c0_19, %c0_20, %c0_21] : memref<1x8x128xf32, #tpu.memory_space<vmem>>, vector<1x8x128xf32>
    tpu.vector_store %arg5[%c0_19, %c0_20, %c0_21], %54 {strides = array<i32>} : memref<1x8x128xf32, #tpu.memory_space<vmem>>, vector<1x8x128xf32>,
    %c0_22 = arith.constant 0 : index
    %c0_23 = arith.constant 0 : index
    %c0_24 = arith.constant 0 : index
    %56 = vector.load %arg6[%c0_22, %c0_23, %c0_24] : memref<1x8x128xf32, #tpu.memory_space<vmem>>, vector<1x8x128xf32>
    %57 = vector.shape_cast %51 : vector<8x128xf32> to vector<1x8x128xf32>
    %58 = arith.addf %56, %57 : vector<1x8x128xf32>
    %c0_25 = arith.constant 0 : index
    %c0_26 = arith.constant 0 : index
    %c0_27 = arith.constant 0 : index
    %59 = vector.load %arg6[%c0_25, %c0_26, %c0_27] : memref<1x8x128xf32, #tpu.memory_space<vmem>>, vector<1x8x128xf32>
    tpu.vector_store %arg6[%c0_25, %c0_26, %c0_27], %58 {strides = array<i32>} : memref<1x8x128xf32, #tpu.memory_space<vmem>>, vector<1x8x128xf32>,
    return
  }
  func.func @transform_0(%arg0: i32, %arg1: i32) -> (i32, i32) {
    %c1_i32 = arith.constant 1 : i32
    %0 = arith.muli %arg0, %c1_i32 : i32
    %1 = arith.addi %0, %arg1 : i32
    %c0_i32 = arith.constant 0 : i32
    %2 = arith.minsi %1, %c0_i32 : i32
    %c0_i32_0 = arith.constant 0 : i32
    %c0_i32_1 = arith.constant 0 : i32
    return %2, %c0_i32_0 : i32, i32
  }
  func.func @transform_1(%arg0: i32, %arg1: i32) -> (i32, i32) {
    %c1_i32 = arith.constant 1 : i32
    %0 = arith.muli %arg0, %c1_i32 : i32
    %1 = arith.addi %0, %arg1 : i32
    %c0_i32 = arith.constant 0 : i32
    %2 = arith.minsi %1, %c0_i32 : i32
    %c0_i32_0 = arith.constant 0 : i32
    %c0_i32_1 = arith.constant 0 : i32
    return %2, %c0_i32_0 : i32, i32
  }
  func.func @transform_2(%arg0: i32, %arg1: i32) -> (i32, i32) {
    %c1_i32 = arith.constant 1 : i32
    %0 = arith.muli %arg0, %c1_i32 : i32
    %1 = arith.addi %0, %arg1 : i32
    %c0_i32 = arith.constant 0 : i32
    %2 = arith.minsi %1, %c0_i32 : i32
    %c0_i32_0 = arith.constant 0 : i32
    %c0_i32_1 = arith.constant 0 : i32
    return %2, %c0_i32_0 : i32, i32
  }
  func.func @transform_3(%arg0: i32, %arg1: i32) -> (i32, i32, i32) {
    %c0_i32 = arith.constant 0 : i32
    %c0_i32_0 = arith.constant 0 : i32
    %c0_i32_1 = arith.constant 0 : i32
    return %arg0, %c0_i32, %c0_i32_0 : i32, i32, i32
  }
  func.func @transform_4(%arg0: i32, %arg1: i32) -> (i32, i32, i32) {
    %c0_i32 = arith.constant 0 : i32
    %c0_i32_0 = arith.constant 0 : i32
    %c0_i32_1 = arith.constant 0 : i32
    return %arg0, %c0_i32, %c0_i32_0 : i32, i32, i32
  }
}

</mosaic_0001>

<bundles_post_ra>
// kernel: tpu_custom_call.1
= control target key start
LH: loop header
LB: loop body
LE: loop exit
PB: predicated region body
PF: predicated region fallthrough
CT: control target
= control target key end

     0   :  { %10 = vsyncpa [#allocation3], 0  ;;  %s345_s0 = inlined_call_operand.hbm [shape: f32[16,128], index: 0, kind: input, shape index: {}]   ;;  %s346_s1 = inlined_call_operand.hbm [shape: f32[16,128], index: 1, kind: input, shape index: {}]   ;;  %s347_s2 = inlined_call_operand.hbm [shape: f32[16,128], index: 2, kind: input, shape index: {}]   ;;  %s348_s3 = inlined_call_operand.hbm [shape: f32[1,8,128], index: 3, kind: output, shape index: {0}]   ;;  %s349_s4 = inlined_call_operand.hbm [shape: f32[1,8,128], index: 4, kind: output, shape index: {1}]  }
   0x1   :  { %11 = vsyncpa [#allocation6], 0 }
   0x2   :  { %12 = vsyncpa [#allocation4], 0 }
   0x3   :  { %13 = vsyncpa [#allocation10], 0  ;;  %s298_s15 = smov [#allocation5]   ;;  %s299_s17 = smov [#allocation2]  }
   0x4   :  { %s43_s16 = sshll.u32 %s298_s15, 4  ;;  %s25_s18 = sshll.u32 %s299_s17, 4  ;;  %s44_s16 = int_to_ptr.vmem [resolvable:$true] %s43_s16  ;;  %s26_s18 = int_to_ptr.vmem [resolvable:$true] %s25_s18 }
   0x5   :  { %s198_s19 = scalar_lea.vmem %s44_s16, 256  ;;  %p203_p1 = scmp.lt.s32.totalorder %s44_s16, %s44_s16 }
   0x6   :  { %p199_p0 = scmp.ne.s32.totalorder %s44_s16, %s198_s19  ;;  %p204_p2 = scmp.lt.s32.totalorder %s198_s19, %s198_s19 }
   0x8   :  { %p205_p3 = por %p204_p2, %p203_p1 }
   0xa   :  { %p206_p4 = pnand %p205_p3, %p199_p0 }
   0xc   :  { %209 = shalt.err (!%p206_p4)
}
   0xd   :  { %s300_s20 = smov 128   ;;  %s301_s21 = smov 8  }
   0xe   :  { %49 = dma.hbm_to_vmem [thread:$0]  %s346_s1, 256, %s44_s16, [#allocation6], %s300_s20, %s300_s20, %s301_s21  }
   0xf   :  { %s218_s24 = scalar_lea.vmem %s26_s18, 256  ;;  %p223_p6 = scmp.lt.s32.totalorder %s26_s18, %s26_s18 }
  0x10   :  { %p219_p5 = scmp.ne.s32.totalorder %s26_s18, %s218_s24  ;;  %p224_p7 = scmp.lt.s32.totalorder %s218_s24, %s218_s24 }
  0x12   :  { %p225_p8 = por %p224_p7, %p223_p6 }
  0x14   :  { %p226_p9 = pnand %p225_p8, %p219_p5 }
  0x16   :  { %229 = shalt.err (!%p226_p9)
}
  0x17   :  { %31 = dma.hbm_to_vmem [thread:$0]  %s345_s0, 256, %s26_s18, [#allocation3], %s300_s20, %s300_s20, %s301_s21  }
  0x18   :  { %s302_s27 = smov [#allocation7]  }
  0x19   :  { %s61_s28 = sshll.u32 %s302_s27, 4  ;;  %s62_s28 = int_to_ptr.vmem [resolvable:$true] %s61_s28 }
  0x1a   :  { %s238_s29 = scalar_lea.vmem %s62_s28, 256  ;;  %p243_p11 = scmp.lt.s32.totalorder %s62_s28, %s62_s28 }
  0x1b   :  { %p239_p10 = scmp.ne.s32.totalorder %s62_s28, %s238_s29  ;;  %p244_p12 = scmp.lt.s32.totalorder %s238_s29, %s238_s29 }
  0x1d   :  { %p245_p13 = por %p244_p12, %p243_p11 }
  0x1f   :  { %p246_p0 = pnand %p245_p13, %p239_p10 }
  0x21   :  { %249 = shalt.err (!%p246_p0)
}
  0x22   :  { %67 = dma.hbm_to_vmem [thread:$0]  %s347_s2, 256, %s62_s28, [#allocation6], %s300_s20, %s300_s20, %s301_s21  }
  0x23   :  { %290 = dma.done.wait [#allocation3], 256  }
  0x24   :  { %291 = vsyncadd [#allocation3], 4294967040 }
  0x25   :  { %292 = dma.done.wait [#allocation6], 512  }
  0x26   :  { %293 = vsyncadd [#allocation6], 4294966784  ;;  %v95_v0 = vld [vmem:[#allocation2] sm:$0xff]  ;;  %v113_v3 = vld [vmem:[#allocation2 + $0x8] sm:$0xff]  ;;  %s303_s0 = smov [#allocation9]  }
  0x27   :  { %182 = vlog2.f32 %v95_v0  ;;  %v100_v1 = vsub.f32 1.0, %v95_v0  ;;  %v108_v2 = vld [vmem:[#allocation7] sm:$0xff]  ;;  %v128_v4 = vld [vmem:[#allocation7 + $0x8] sm:$0xff]  ;;  %s154_s5 = sshll.u32 %s303_s0, 4  ;;  %v119_v5 = vsub.f32 1.0, %v113_v3  ;;  %s155_s5 = int_to_ptr.vmem [resolvable:$true] %s154_s5 }
  0x28   :  { %184 = vlog2.f32 %v113_v3  ;;  %v131_v6 = vadd.f32 %v128_v4, %v108_v2  ;;  %s250_s2 = scalar_lea.vmem %s155_s5, 128  ;;  %p255_p2 = scmp.lt.s32.totalorder %s155_s5, %s155_s5 }
  0x29   :  { %186 = vlog2.f32 %v100_v1  ;;  %p251_p1 = scmp.ne.s32.totalorder %s155_s5, %s250_s2  ;;  %p256_p3 = scmp.lt.s32.totalorder %s250_s2, %s250_s2 }
  0x2a   :  { %188 = vlog2.f32 %v119_v5  ;;  %137 = vst [vmem:[#allocation9] sm:$0xff] %v131_v6 }
  0x2b   :  { %p257_p4 = por %p256_p3, %p255_p2 }
  0x2d   :  { %p258_p5 = pnand %p257_p4, %p251_p1 }
  0x2f   :  { %261 = shalt.err (!%p258_p5)
}
  0x30   :  { %157 = dma.vmem_to_hbm [thread:$0]  %s155_s5, 128, %s349_s4, [#allocation10]   ;;  %v96_v18 = vld [vmem:[#allocation5] sm:$0xff]  ;;  %v115_v21 = vld [vmem:[#allocation5 + $0x8] sm:$0xff] }
  0x31   :  { %s304_s4 = smov [#allocation8]  }
  0x32   :  { %s144_s8 = sshll.u32 %s304_s4, 4  ;;  %s145_s8 = int_to_ptr.vmem [resolvable:$true] %s144_s8 }
  0x33   :  { %s270_s9 = scalar_lea.vmem %s145_s8, 128  ;;  %p275_p7 = scmp.lt.s32.totalorder %s145_s8, %s145_s8 }
  0x34   :  { %v183_v7 = vpop.eup %182  ;;  %p271_p6 = scmp.ne.s32.totalorder %s145_s8, %s270_s9  ;;  %p276_p8 = scmp.lt.s32.totalorder %s270_s9, %s270_s9 }
  0x35   :  { %v185_v8 = vpop.eup %184  ;;  %v98_v9 = vmul.f32 0.6931472, %v183_v7 }
  0x36   :  { %v187_v10 = vpop.eup %186  ;;  %v117_v11 = vmul.f32 0.6931472, %v185_v8  ;;  %p277_p9 = por %p276_p8, %p275_p7 }
  0x37   :  { %v189_v12 = vpop.eup %188  ;;  %v99_v13 = vmax.f32 %v98_v9, -100.0  ;;  %v102_v14 = vmul.f32 0.6931472, %v187_v10 }
  0x38   :  { %v118_v15 = vmax.f32 %v117_v11, -100.0  ;;  %v121_v16 = vmul.f32 0.6931472, %v189_v12  ;;  %p278_p10 = pnand %p277_p9, %p271_p6 }
  0x39   :  { %v103_v17 = vmax.f32 %v102_v14, -100.0 }
  0x3a   :  { %v122_v19 = vmax.f32 %v121_v16, -100.0 }
  0x3b   :  { %v104_v20 = vsub.f32 %v99_v13, %v103_v17 }
  0x3c   :  { %v123_v22 = vsub.f32 %v118_v15, %v122_v19 }
  0x3d   :  { %v105_v23 = vmul.f32 %v104_v20, %v96_v18 }
  0x3e   :  { %v124_v24 = vmul.f32 %v123_v22, %v115_v21 }
  0x3f   :  { %v106_v25 = vadd.f32 %v105_v23, %v103_v17 }
  0x40   :  { %v125_v26 = vadd.f32 %v124_v24, %v122_v19 }
  0x41   :  { %v107_v27 = vsub.f32 0.0, %v106_v25 }
  0x42   :  { %v126_v28 = vsub.f32 0.0, %v125_v26 }
  0x43   :  { %v109_v29 = vmul.f32 %v108_v2, %v107_v27 }
  0x44   :  { %v129_v30 = vmul.f32 %v128_v4, %v126_v28 }
  0x46   :  { %v130_v31 = vadd.f32 %v129_v30, %v109_v29 }
  0x48   :  { %134 = vst [vmem:[#allocation8] sm:$0xff] %v130_v31 }
  0x49   :  { %281 = shalt.err (!%p278_p10)
}
  0x4a   :  { %147 = dma.vmem_to_hbm [thread:$0]  %s145_s8, 128, %s348_s3, [#allocation4]  }
  0x4b   :  { %294 = dma.done.wait [#allocation4], 128  }
  0x4c   :  { %295 = vsyncadd [#allocation4], 4294967168 }
  0x4d   :  { %296 = dma.done.wait [#allocation10], 128  }
  0x4e   :  { %297 = vsyncadd [#allocation10], 4294967168 }
  0x4f   :  { %164 = vsyncpa [#allocation3], 1 }
  0x50   :  { %165 = vsyncpa [#allocation6], 1 }
  0x51   :  { %166 = vsyncpa [#allocation4], 1 }
  0x52   :  { %167 = vsyncpa [#allocation10], 1 }

</bundles_post_ra>
